<compile_context>
chip_gen: v6e
topology: v6e:2x2x1
jax: 0.10.0
libtpu: 0.0.40
codegen_flags: <defaults>
</compile_context>

<pallas_src>
import math

import jax
import jax.numpy as jnp
from jax.experimental import pallas as pl
from jax.experimental.pallas import tpu as pltpu


# ----------------------------------------------------------------------------
# Pallas kernels
# ----------------------------------------------------------------------------
def _noisy_linear_train_kernel(x_ref, xs_ref, wmu_ref, wsig_ref, rows_ref,
                               o_ref, acc_ref):
    # x / xs: (B_p, tk) matmul_dtype;  wmu / wsig: (tk, tn) matmul_dtype
    # rows: (2, tn) f32 = [bias_mu + bias_sigma*bias_eps ; eps_out]
    k = pl.program_id(1)

    @pl.when(k == 0)
    def _():
        acc_ref[...] = jnp.zeros_like(acc_ref)

    y_mu = jnp.dot(x_ref[...], wmu_ref[...],
                   preferred_element_type=jnp.float32)        # (B_p, tn) f32
    y_sig = jnp.dot(xs_ref[...], wsig_ref[...],
                    preferred_element_type=jnp.float32)       # (B_p, tn) f32
    acc_ref[...] += y_mu + rows_ref[1:2, :] * y_sig

    @pl.when(k == pl.num_programs(1) - 1)
    def _():
        o_ref[...] = (acc_ref[...] + rows_ref[0:1, :]).astype(o_ref.dtype)


def _noisy_linear_eval_kernel(x_ref, wmu_ref, bmu_ref, o_ref, acc_ref):
    k = pl.program_id(1)

    @pl.when(k == 0)
    def _():
        acc_ref[...] = jnp.zeros_like(acc_ref)

    acc_ref[...] += jnp.dot(x_ref[...], wmu_ref[...],
                            preferred_element_type=jnp.float32)

    @pl.when(k == pl.num_programs(1) - 1)
    def _():
        o_ref[...] = (acc_ref[...] + bmu_ref[...]).astype(o_ref.dtype)


# ----------------------------------------------------------------------------
# Helpers
# ----------------------------------------------------------------------------
def _round_up(n, m):
    return ((n + m - 1) // m) * m


def _pick_tile(total, cap):
    """Largest multiple of 128 that divides `total` (itself a multiple of 128)
    and is <= cap (always at least 128)."""
    cap = max(128, min(cap, total))
    best = 128
    t = 256
    while t <= cap:
        if total % t == 0:
            best = t
        t += 128
    return best


# ----------------------------------------------------------------------------
# One-time parameter preparation (hoisted out of the per-call forward)
# ----------------------------------------------------------------------------
def prepare_noisy_linear(params, *, matmul_dtype=jnp.bfloat16):
    """Pad / transpose / pre-cast parameters once; reuse for every forward."""
    out_f, in_f = params["weight_mu"].shape
    in_p = _round_up(in_f, 128)
    out_p = _round_up(out_f, 128)
    f32 = jnp.float32

    def pad_transpose(w):  # (out, in) -> (in_p, out_p), zero-padded
        wt = jnp.zeros((in_p, out_p), f32).at[:in_f, :out_f].set(
            w.astype(f32).T)
        return wt.astype(matmul_dtype)

    wmu_t = pad_transpose(params["weight_mu"])
    wsig_t = pad_transpose(params["weight_sigma"])

    bias_noisy = (params["bias_mu"].astype(f32)
                  + params["bias_sigma"].astype(f32)
                  * params["bias_epsilon"].astype(f32))
    rows = jnp.zeros((2, out_p), f32)
    rows = rows.at[0, :out_f].set(bias_noisy)
    rows = rows.at[1, :out_f].set(params["eps_out"].astype(f32))

    bias_mu = jnp.zeros((1, out_p), f32).at[0, :out_f].set(
        params["bias_mu"].astype(f32))
    eps_in = jnp.zeros((1, in_p), f32).at[0, :in_f].set(
        params["eps_in"].astype(f32))

    return dict(wmu_t=wmu_t, wsig_t=wsig_t, rows=rows, bias_mu=bias_mu,
                eps_in=eps_in, in_features=in_f, out_features=out_f,
                in_p=in_p, out_p=out_p, matmul_dtype=matmul_dtype)


# ----------------------------------------------------------------------------
# Forward
# ----------------------------------------------------------------------------
def noisy_linear_forward(x, prep, *, training=True, use_pallas=None,
                         out_dtype=None):
    """Forward pass of NoisyLinear using prepared parameters `prep`."""
    B, in_f = x.shape
    assert in_f == prep["in_features"]
    out_f = prep["out_features"]
    in_p, out_p = prep["in_p"], prep["out_p"]
    md = prep["matmul_dtype"]
    f32 = jnp.float32
    out_dtype = out_dtype or x.dtype
    wbytes = jnp.dtype(md).itemsize

    if use_pallas is None:
        # Tiny layers: pallas_call fixed cost dominates -> plain XLA dot.
        use_pallas = in_p * out_p * wbytes >= (256 * 1024)

    if not use_pallas:
        x_p = jnp.zeros((B, in_p), f32).at[:, :in_f].set(x.astype(f32))
        y = jnp.dot(x_p.astype(md), prep["wmu_t"],
                    preferred_element_type=f32)
        if training:
            xs_p = x_p * prep["eps_in"]
            y = (y + prep["rows"][1:2, :]
                 * jnp.dot(xs_p.astype(md), prep["wsig_t"],
                           preferred_element_type=f32)
                 + prep["rows"][0:1, :])
        else:
            y = y + prep["bias_mu"]
        return y[:, :out_f].astype(out_dtype)

    # ---------------- Pallas path ----------------
    B_p = _round_up(max(B, 1), 8)

    # Output tile: lane-dense, and >= 2 tiles whenever out_p permits so the
    # "parallel" axis can be sharded across both v7x TensorCores.
    tn_cap = 256 if out_p < 256 else min(256, out_p // 2)
    tn = _pick_tile(out_p, tn_cap)

    # Reduction tile: bound double-buffered input VMEM (safe for v5e's 16 MiB
    # default scoped VMEM and v7x's 64 MiB physical VMEM).
    n_w = 2 if training else 1          # weight tensors streamed
    n_x = 2 if training else 1          # activation tensors streamed
    input_budget = 10 * 1024 * 1024
    tk_cap = max(128, input_budget // (2 * (n_w * tn + n_x * B_p) * wbytes))
    tk = _pick_tile(in_p, tk_cap)

    out_bytes = jnp.dtype(out_dtype).itemsize
    vmem_est = (2 * n_w * tk * tn * wbytes        # weight tiles (dbl-buffered)
                + 2 * n_x * B_p * tk * wbytes     # activation tiles
                + 2 * 8 * tn * 4                  # bias/eps rows (padded)
                + 2 * B_p * tn * out_bytes        # output tile
                + B_p * tn * 4)                   # f32 accumulator scratch
    vmem_limit = int(min(max(2 * vmem_est, 16 * 1024 * 1024),
                         48 * 1024 * 1024))

    # Per-call activation prep (small): pad, noise-scale in f32, cast once.
    x_p = jnp.zeros((B_p, in_p), f32).at[:B, :in_f].set(x.astype(f32))
    x_md = x_p.astype(md)

    grid = (out_p // tn, in_p // tk)
    cparams = pltpu.CompilerParams(
        dimension_semantics=("parallel", "arbitrary"),
        vmem_limit_bytes=vmem_limit)
    out_shape = jax.ShapeDtypeStruct((B_p, out_p), out_dtype)
    scratch = [pltpu.VMEM((B_p, tn), jnp.float32)]

    if training:
        xs_md = (x_p * prep["eps_in"]).astype(md)
        y_p = pl.pallas_call(
            _noisy_linear_train_kernel,
            out_shape=out_shape,
            grid=grid,
            in_specs=[
                pl.BlockSpec((B_p, tk), lambda j, k: (0, k)),   # x
                pl.BlockSpec((B_p, tk), lambda j, k: (0, k)),   # x * eps_in
                pl.BlockSpec((tk, tn), lambda j, k: (k, j)),    # weight_mu^T
                pl.BlockSpec((tk, tn), lambda j, k: (k, j)),    # weight_sig^T
                pl.BlockSpec((2, tn), lambda j, k: (0, j)),     # [bias;eps_out]
            ],
            out_specs=pl.BlockSpec((B_p, tn), lambda j, k: (0, j)),
            scratch_shapes=scratch,
            compiler_params=cparams,
        )(x_md, xs_md, prep["wmu_t"], prep["wsig_t"], prep["rows"])
    else:
        y_p = pl.pallas_call(
            _noisy_linear_eval_kernel,
            out_shape=out_shape,
            grid=grid,
            in_specs=[
                pl.BlockSpec((B_p, tk), lambda j, k: (0, k)),   # x
                pl.BlockSpec((tk, tn), lambda j, k: (k, j)),    # weight_mu^T
                pl.BlockSpec((1, tn), lambda j, k: (0, j)),     # bias_mu
            ],
            out_specs=pl.BlockSpec((B_p, tn), lambda j, k: (0, j)),
            scratch_shapes=scratch,
            compiler_params=cparams,
        )(x_md, prep["wmu_t"], prep["bias_mu"])

    return y_p[:B, :out_f]


# ----------------------------------------------------------------------------
# Deterministic parameter initialization (mirrors NoisyLinear.__init__ /
# reset_parameters / reset_noise of the reference module)
# ----------------------------------------------------------------------------
def _scale_noise(key, size):
    # x.sign() * x.abs().sqrt()
    x = jax.random.normal(key, (size,), dtype=jnp.float32)
    return jnp.sign(x) * jnp.sqrt(jnp.abs(x))


def init_noisy_linear(key, in_features, out_features, std_init=0.5):
    k_wmu, k_bmu, k_ein, k_eout, k_beps = jax.random.split(key, 5)
    mu_range = 1.0 / math.sqrt(in_features)

    weight_mu = jax.random.uniform(
        k_wmu, (out_features, in_features), jnp.float32, -mu_range, mu_range)
    weight_sigma = jnp.full((out_features, in_features),
                            std_init / math.sqrt(in_features), jnp.float32)
    bias_mu = jax.random.uniform(
        k_bmu, (out_features,), jnp.float32, -mu_range, mu_range)
    bias_sigma = jnp.full((out_features,),
                          std_init / math.sqrt(out_features), jnp.float32)

    # reset_noise(): factorized Gaussian noise.  The reference module draws
    # bias_epsilon from a FRESH _scale_noise(out_features) (not eps_out), so
    # we do the same.  weight_epsilon = outer(eps_out, eps_in) is never
    # materialized; only its two factors are kept for the kernel.
    eps_in = _scale_noise(k_ein, in_features)
    eps_out = _scale_noise(k_eout, out_features)
    bias_epsilon = _scale_noise(k_beps, out_features)

    return dict(
        weight_mu=weight_mu, weight_sigma=weight_sigma,
        bias_mu=bias_mu, bias_sigma=bias_sigma, bias_epsilon=bias_epsilon,
        eps_in=eps_in, eps_out=eps_out,
    )


# ----------------------------------------------------------------------------
# Main
# ----------------------------------------------------------------------------
if __name__ == "__main__":
    key = jax.random.PRNGKey(0)
    k_params, k_x = jax.random.split(key)

    B, in_features, out_features = 8, 32, 16
    params = init_noisy_linear(k_params, in_features, out_features)
    x = jax.random.normal(k_x, (B, in_features), dtype=jnp.float32)

    # One-time parameter preparation (pad / transpose / cast), reused below.
    prep_f32 = prepare_noisy_linear(params, matmul_dtype=jnp.float32)
    prep_bf16 = prepare_noisy_linear(params, matmul_dtype=jnp.bfloat16)

    # Force the Pallas path (the size-based dispatch would pick plain XLA at
    # these tiny demo shapes).
    y_train_f32 = jax.block_until_ready(
        noisy_linear_forward(x, prep_f32, training=True, use_pallas=True))
    y_eval_f32 = jax.block_until_ready(
        noisy_linear_forward(x, prep_f32, training=False, use_pallas=True))
    y_train_bf16 = jax.block_until_ready(
        noisy_linear_forward(x, prep_bf16, training=True, use_pallas=True))
    y_eval_bf16 = jax.block_until_ready(
        noisy_linear_forward(x, prep_bf16, training=False, use_pallas=True))
    # Size-based dispatch (XLA fallback at this size) for sanity.
    y_train_auto = jax.block_until_ready(
        noisy_linear_forward(x, prep_f32, training=True))

    # Pure-JAX reference (materialized noisy weight, as in the PyTorch module).
    w_eps = jnp.outer(params["eps_out"], params["eps_in"])
    w_ref = params["weight_mu"] + params["weight_sigma"] * w_eps
    b_ref = params["bias_mu"] + params["bias_sigma"] * params["bias_epsilon"]
    ref_train = x @ w_ref.T + b_ref
    ref_eval = x @ params["weight_mu"].T + params["bias_mu"]

    assert y_train_f32.shape == (B, out_features)
    assert y_eval_f32.shape == (B, out_features)
    assert jnp.allclose(y_train_f32, ref_train, atol=1e-4, rtol=1e-4)
    assert jnp.allclose(y_eval_f32, ref_eval, atol=1e-4, rtol=1e-4)
    assert jnp.allclose(y_train_bf16, ref_train, atol=3e-2, rtol=3e-2)
    assert jnp.allclose(y_eval_bf16, ref_eval, atol=3e-2, rtol=3e-2)
    assert jnp.allclose(y_train_auto, ref_train, atol=1e-4, rtol=1e-4)

    print("KERNEL_OK")
</pallas_src>

<mosaic_0001>
module attributes {stable_mosaic.version = 11 : i64} {
  func.func @_noisy_linear_train_kernel(%arg0: i32, %arg1: i32, %arg2: memref<8x128xf32, #tpu.memory_space<vmem>>, %arg3: memref<8x128xf32, #tpu.memory_space<vmem>>, %arg4: memref<128x128xf32, #tpu.memory_space<vmem>>, %arg5: memref<128x128xf32, #tpu.memory_space<vmem>>, %arg6: memref<2x128xf32, #tpu.memory_space<vmem>>, %arg7: memref<8x128xf32, #tpu.memory_space<vmem>>, %arg8: memref<8x128xf32, #tpu.memory_space<vmem>>) attributes {dimension_semantics = [#tpu.dimension_semantics<parallel>, #tpu.dimension_semantics<arbitrary>], iteration_bounds = array<i64: 1, 1>, scalar_prefetch = 0 : i64, scratch_operands = 1 : i64, tpu.core_type = #tpu.core_type<tc>, window_params = [{transform_indices = @transform_0, window_bounds = array<i64: 8, 128>}, {transform_indices = @transform_1, window_bounds = array<i64: 8, 128>}, {transform_indices = @transform_2, window_bounds = array<i64: 128, 128>}, {transform_indices = @transform_3, window_bounds = array<i64: 128, 128>}, {transform_indices = @transform_4, window_bounds = array<i64: 2, 128>}, {transform_indices = @transform_5, window_bounds = array<i64: 8, 128>}]} {
    %c0_i32 = arith.constant 0 : i32
    %0 = arith.cmpi eq, %arg1, %c0_i32 : i32
    %1 = arith.extui %0 : i1 to i32
    %c0_i32_0 = arith.constant 0 : i32
    %2 = arith.cmpi ne, %1, %c0_i32_0 : i32
    scf.if %2 {
      %cst_16 = arith.constant 0.000000e+00 : f32
      %19 = vector.broadcast %cst_16 : f32 to vector<8x128xf32>
      %c0_17 = arith.constant 0 : index
      %c0_18 = arith.constant 0 : index
      %20 = vector.load %arg8[%c0_17, %c0_18] : memref<8x128xf32, #tpu.memory_space<vmem>>, vector<8x128xf32>
      tpu.vector_store %arg8[%c0_17, %c0_18], %19 {strides = array<i32>} : memref<8x128xf32, #tpu.memory_space<vmem>>, vector<8x128xf32>,
    } else {
    }
    %c0 = arith.constant 0 : index
    %c0_1 = arith.constant 0 : index
    %3 = vector.load %arg2[%c0, %c0_1] : memref<8x128xf32, #tpu.memory_space<vmem>>, vector<8x128xf32>
    %c0_2 = arith.constant 0 : index
    %c0_3 = arith.constant 0 : index
    %4 = vector.load %arg4[%c0_2, %c0_3] : memref<128x128xf32, #tpu.memory_space<vmem>>, vector<128x128xf32>
    %cst = arith.constant dense<0.000000e+00> : vector<8x128xf32>
    %5 = tpu.matmul %3, %4, %cst {dimension_numbers = #tpu.dot_dimension_numbers<[1], [0], [0], [1], [0, 0, 1, 1], [], []>} : vector<8x128xf32>, vector<128x128xf32>, vector<8x128xf32> -> vector<8x128xf32>
    %c0_4 = arith.constant 0 : index
    %c0_5 = arith.constant 0 : index
    %6 = vector.load %arg3[%c0_4, %c0_5] : memref<8x128xf32, #tpu.memory_space<vmem>>, vector<8x128xf32>
    %c0_6 = arith.constant 0 : index
    %c0_7 = arith.constant 0 : index
    %7 = vector.load %arg5[%c0_6, %c0_7] : memref<128x128xf32, #tpu.memory_space<vmem>>, vector<128x128xf32>
    %cst_8 = arith.constant dense<0.000000e+00> : vector<8x128xf32>
    %8 = tpu.matmul %6, %7, %cst_8 {dimension_numbers = #tpu.dot_dimension_numbers<[1], [0], [0], [1], [0, 0, 1, 1], [], []>} : vector<8x128xf32>, vector<128x128xf32>, vector<8x128xf32> -> vector<8x128xf32>
    %c0_9 = arith.constant 0 : index
    %c0_10 = arith.constant 0 : index
    %9 = vector.load %arg8[%c0_9, %c0_10] : memref<8x128xf32, #tpu.memory_space<vmem>>, vector<8x128xf32>
    %c1 = arith.constant 1 : index
    %c0_11 = arith.constant 0 : index
    %10 = vector.load %arg6[%c1, %c0_11] : memref<2x128xf32, #tpu.memory_space<vmem>>, vector<1x128xf32>
    %11 = vector.broadcast %10 : vector<1x128xf32> to vector<8x128xf32>
    %12 = arith.mulf %11, %8 : vector<8x128xf32>
    %13 = arith.addf %5, %12 : vector<8x128xf32>
    %14 = arith.addf %9, %13 : vector<8x128xf32>
    %c0_12 = arith.constant 0 : index
    %c0_13 = arith.constant 0 : index
    %15 = vector.load %arg8[%c0_12, %c0_13] : memref<8x128xf32, #tpu.memory_space<vmem>>, vector<8x128xf32>
    tpu.vector_store %arg8[%c0_12, %c0_13], %14 {strides = array<i32>} : memref<8x128xf32, #tpu.memory_space<vmem>>, vector<8x128xf32>,
    %c0_i32_14 = arith.constant 0 : i32
    %16 = arith.cmpi eq, %arg1, %c0_i32_14 : i32
    %17 = arith.extui %16 : i1 to i32
    %c0_i32_15 = arith.constant 0 : i32
    %18 = arith.cmpi ne, %17, %c0_i32_15 : i32
    scf.if %18 {
      %c0_16 = arith.constant 0 : index
      %c0_17 = arith.constant 0 : index
      %19 = vector.load %arg8[%c0_16, %c0_17] : memref<8x128xf32, #tpu.memory_space<vmem>>, vector<8x128xf32>
      %c0_18 = arith.constant 0 : index
      %c0_19 = arith.constant 0 : index
      %20 = vector.load %arg6[%c0_18, %c0_19] : memref<2x128xf32, #tpu.memory_space<vmem>>, vector<1x128xf32>
      %21 = vector.broadcast %20 : vector<1x128xf32> to vector<8x128xf32>
      %22 = arith.addf %19, %21 : vector<8x128xf32>
      %c0_20 = arith.constant 0 : index
      %c0_21 = arith.constant 0 : index
      %23 = vector.load %arg7[%c0_20, %c0_21] : memref<8x128xf32, #tpu.memory_space<vmem>>, vector<8x128xf32>
      tpu.vector_store %arg7[%c0_20, %c0_21], %22 {strides = array<i32>} : memref<8x128xf32, #tpu.memory_space<vmem>>, vector<8x128xf32>,
    } else {
    }
    return
  }
  func.func @transform_0(%arg0: i32, %arg1: i32) -> (i32, i32) {
    %c0_i32 = arith.constant 0 : i32
    %c0_i32_0 = arith.constant 0 : i32
    return %c0_i32, %arg1 : i32, i32
  }
  func.func @transform_1(%arg0: i32, %arg1: i32) -> (i32, i32) {
    %c0_i32 = arith.constant 0 : i32
    %c0_i32_0 = arith.constant 0 : i32
    return %c0_i32, %arg1 : i32, i32
  }
  func.func @transform_2(%arg0: i32, %arg1: i32) -> (i32, i32) {
    %c0_i32 = arith.constant 0 : i32
    return %arg1, %arg0 : i32, i32
  }
  func.func @transform_3(%arg0: i32, %arg1: i32) -> (i32, i32) {
    %c0_i32 = arith.constant 0 : i32
    return %arg1, %arg0 : i32, i32
  }
  func.func @transform_4(%arg0: i32, %arg1: i32) -> (i32, i32) {
    %c0_i32 = arith.constant 0 : i32
    %c0_i32_0 = arith.constant 0 : i32
    return %c0_i32, %arg0 : i32, i32
  }
  func.func @transform_5(%arg0: i32, %arg1: i32) -> (i32, i32) {
    %c0_i32 = arith.constant 0 : i32
    %c0_i32_0 = arith.constant 0 : i32
    return %c0_i32, %arg0 : i32, i32
  }
}

</mosaic_0001>

<bundles_post_ra>
// kernel: tpu_custom_call.1
= control target key start
LH: loop header
LB: loop body
LE: loop exit
PB: predicated region body
PF: predicated region fallthrough
CT: control target
= control target key end

     0   :  { %10 = vsyncpa [#allocation4], 0  ;;  %s605_s0 = inlined_call_operand.hbm [shape: f32[8,128], index: 0, kind: input, shape index: {}]   ;;  %s606_s1 = inlined_call_operand.hbm [shape: f32[8,128], index: 1, kind: input, shape index: {}]   ;;  %s607_s2 = inlined_call_operand.hbm [shape: f32[128,128], index: 2, kind: input, shape index: {}]   ;;  %s608_s3 = inlined_call_operand.hbm [shape: f32[128,128], index: 3, kind: input, shape index: {}]   ;;  %s609_s4 = inlined_call_operand.vmem [shape: f32[2,128], index: 4, kind: input, shape index: {}]   ;;  %s610_s5 = inlined_call_operand.hbm [shape: f32[8,128], index: 5, kind: output, shape index: {}]  }
   0x1   :  { %11 = vsyncpa [#allocation7], 0 }
   0x2   :  { %12 = vsyncpa [#allocation10], 0 }
   0x3   :  { %13 = vsyncpa [#allocation5], 0  ;;  %s511_s18 = smov [#allocation6]   ;;  %s512_s20 = smov [#allocation3]  }
   0x4   :  { %s30_s19 = sshll.u32 %s511_s18, 4  ;;  %s20_s21 = sshll.u32 %s512_s20, 4  ;;  %s31_s19 = int_to_ptr.vmem [resolvable:$true] %s30_s19  ;;  %s21_s21 = int_to_ptr.vmem [resolvable:$true] %s20_s21 }
   0x5   :  { %s411_s22 = scalar_lea.vmem %s31_s19, 128  ;;  %p416_p1 = scmp.lt.s32.totalorder %s31_s19, %s31_s19 }
   0x6   :  { %p412_p0 = scmp.ne.s32.totalorder %s31_s19, %s411_s22  ;;  %p417_p2 = scmp.lt.s32.totalorder %s411_s22, %s411_s22 }
   0x8   :  { %p418_p3 = por %p417_p2, %p416_p1 }
   0xa   :  { %p419_p4 = pnand %p418_p3, %p412_p0 }
   0xc   :  { %422 = shalt.err (!%p419_p4)
}
   0xd   :  { %33 = dma.hbm_to_vmem [thread:$0]  %s606_s1, 128, %s31_s19, [#allocation7]  }
   0xe   :  { %s431_s25 = scalar_lea.vmem %s21_s21, 128  ;;  %p436_p6 = scmp.lt.s32.totalorder %s21_s21, %s21_s21 }
   0xf   :  { %p432_p5 = scmp.ne.s32.totalorder %s21_s21, %s431_s25  ;;  %p437_p7 = scmp.lt.s32.totalorder %s431_s25, %s431_s25 }
  0x11   :  { %p438_p8 = por %p437_p7, %p436_p6 }
  0x13   :  { %p439_p9 = pnand %p438_p8, %p432_p5 }
  0x15   :  { %442 = shalt.err (!%p439_p9)
}
  0x16   :  { %23 = dma.hbm_to_vmem [thread:$0]  %s605_s0, 128, %s21_s21, [#allocation4]  }
  0x17   :  { %s513_s28 = smov [#allocation8]  }
  0x18   :  { %s39_s29 = sshll.u32 %s513_s28, 4  ;;  %s40_s29 = int_to_ptr.vmem [resolvable:$true] %s39_s29 }
  0x19   :  { %s451_s30 = scalar_lea.vmem %s40_s29, 2048  ;;  %p456_p11 = scmp.lt.s32.totalorder %s40_s29, %s40_s29 }
  0x1a   :  { %p452_p10 = scmp.ne.s32.totalorder %s40_s29, %s451_s30  ;;  %p457_p12 = scmp.lt.s32.totalorder %s451_s30, %s451_s30 }
  0x1c   :  { %p458_p13 = por %p457_p12, %p456_p11 }
  0x1e   :  { %p459_p0 = pnand %p458_p13, %p452_p10 }
  0x20   :  { %462 = shalt.err (!%p459_p0)
}
  0x21   :  { %s514_s1 = smov 128   ;;  %s515_s6 = smov 8  }
  0x22   :  { %45 = dma.hbm_to_vmem [thread:$0]  %s607_s2, 2048, %s40_s29, [#allocation7], %s514_s1, %s514_s1, %s515_s6  }
  0x23   :  { %s516_s9 = smov [#allocation9]  }
  0x24   :  { %s51_s10 = sshll.u32 %s516_s9, 4  ;;  %s52_s10 = int_to_ptr.vmem [resolvable:$true] %s51_s10 }
  0x25   :  { %s471_s0 = scalar_lea.vmem %s52_s10, 2048  ;;  %p476_p2 = scmp.lt.s32.totalorder %s52_s10, %s52_s10 }
  0x26   :  { %p472_p1 = scmp.ne.s32.totalorder %s52_s10, %s471_s0  ;;  %p477_p3 = scmp.lt.s32.totalorder %s471_s0, %s471_s0 }
  0x28   :  { %p478_p4 = por %p477_p3, %p476_p2 }
  0x2a   :  { %p479_p5 = pnand %p478_p4, %p472_p1 }
  0x2c   :  { %482 = shalt.err (!%p479_p5)
}
  0x2d   :  { %57 = dma.hbm_to_vmem [thread:$0]  %s608_s3, 2048, %s52_s10, [#allocation10], %s514_s1, %s514_s1, %s515_s6  }
  0x2e   :  { %503 = dma.done.wait [#allocation4], 128  }
  0x2f   :  { %504 = vsyncadd [#allocation4], 4294967168 }
  0x30   :  { %505 = dma.done.wait [#allocation7], 2176  }
  0x31   :  { %506 = vsyncadd [#allocation7], 4294965120 }
  0x32   :  { %507 = dma.done.wait [#allocation10], 2048  }
  0x33   :  { %508 = vsyncadd [#allocation10], 4294965248  ;;  %v517_v0 = vmov 0.0   ;;  %vm518_vm0 = vmmov 0   ;;  %v110_v1 = vld [vmem:[#allocation9 + $0x78] sm:$0xff]  ;;  %v109_v3 = vld [vmem:[#allocation9 + $0x70] sm:$0xff] }
  0x34   :  { %324 = vmatprep.subr.mxu0 %v517_v0  ;;  %359 = vmatprep.subr.mxu1 %v517_v0  ;;  %v93_v2 = vld [vmem:[#allocation8 + $0x78] sm:$0xff]  ;;  %v92_v4 = vld [vmem:[#allocation8 + $0x70] sm:$0xff]  ;;  %v108_v5 = vld [vmem:[#allocation9 + $0x68] sm:$0xff]  ;;  %s519_s15 = smov [#allocation11]  }
  0x35   :  { %356 = vmatprep.mubr.msk.f32.mxu0 %vm518_vm0, %v517_v0  ;;  %391 = vmatprep.mubr.msk.f32.mxu1 %vm518_vm0, %v517_v0  ;;  %v91_v6 = vld [vmem:[#allocation8 + $0x68] sm:$0xff]  ;;  %v107_v7 = vld [vmem:[#allocation9 + $0x60] sm:$0xff]  ;;  %v106_v9 = vld [vmem:[#allocation9 + $0x58] sm:$0xff]  ;;  %s277_s16 = sshll.u32 %s519_s15, 4  ;;  %s278_s16 = int_to_ptr.vmem [resolvable:$true] %s277_s16 }
  0x36   :  { %325 = vmatpush3.msra.mxu0 %v110_v1  ;;  %360 = vmatpush3.msra.mxu1 %v93_v2  ;;  %v90_v8 = vld [vmem:[#allocation8 + $0x60] sm:$0xff]  ;;  %v89_v10 = vld [vmem:[#allocation8 + $0x58] sm:$0xff]  ;;  %v105_v11 = vld [vmem:[#allocation9 + $0x50] sm:$0xff]  ;;  %s483_s17 = scalar_lea.vmem %s278_s16, 128  ;;  %p488_p7 = scmp.lt.s32.totalorder %s278_s16, %s278_s16 }
  0x37   :  { %326 = vmatprep.subr.mxu0 %v517_v0  ;;  %361 = vmatprep.subr.mxu1 %v517_v0  ;;  %v88_v12 = vld [vmem:[#allocation8 + $0x50] sm:$0xff]  ;;  %v104_v13 = vld [vmem:[#allocation9 + $0x48] sm:$0xff]  ;;  %v103_v15 = vld [vmem:[#allocation9 + $0x40] sm:$0xff]  ;;  %p484_p6 = scmp.ne.s32.totalorder %s278_s16, %s483_s17  ;;  %p489_p8 = scmp.lt.s32.totalorder %s483_s17, %s483_s17 }
  0x38   :  { %327 = vmatpush3.msra.mxu0 %v109_v3  ;;  %362 = vmatpush3.msra.mxu1 %v92_v4  ;;  %v87_v14 = vld [vmem:[#allocation8 + $0x48] sm:$0xff]  ;;  %v86_v16 = vld [vmem:[#allocation8 + $0x40] sm:$0xff]  ;;  %v102_v17 = vld [vmem:[#allocation9 + $0x38] sm:$0xff] }
  0x39   :  { %328 = vmatprep.subr.mxu0 %v517_v0  ;;  %363 = vmatprep.subr.mxu1 %v517_v0  ;;  %v85_v18 = vld [vmem:[#allocation8 + $0x38] sm:$0xff]  ;;  %v101_v19 = vld [vmem:[#allocation9 + $0x30] sm:$0xff]  ;;  %v100_v21 = vld [vmem:[#allocation9 + $0x28] sm:$0xff]  ;;  %p490_p9 = por %p489_p8, %p488_p7 }
  0x3a   :  { %329 = vmatpush3.msra.mxu0 %v108_v5  ;;  %364 = vmatpush3.msra.mxu1 %v91_v6  ;;  %v84_v20 = vld [vmem:[#allocation8 + $0x30] sm:$0xff]  ;;  %v83_v22 = vld [vmem:[#allocation8 + $0x28] sm:$0xff]  ;;  %v99_v23 = vld [vmem:[#allocation9 + $0x20] sm:$0xff] }
  0x3b   :  { %330 = vmatprep.subr.mxu0 %v517_v0  ;;  %365 = vmatprep.subr.mxu1 %v517_v0  ;;  %v82_v24 = vld [vmem:[#allocation8 + $0x20] sm:$0xff]  ;;  %v98_v25 = vld [vmem:[#allocation9 + $0x18] sm:$0xff]  ;;  %v97_v27 = vld [vmem:[#allocation9 + $0x10] sm:$0xff]  ;;  %p491_p10 = pnand %p490_p9, %p484_p6 }
  0x3c   :  { %331 = vmatpush3.msra.mxu0 %v107_v7  ;;  %366 = vmatpush3.msra.mxu1 %v90_v8  ;;  %v81_v26 = vld [vmem:[#allocation8 + $0x18] sm:$0xff]  ;;  %v80_v28 = vld [vmem:[#allocation8 + $0x10] sm:$0xff]  ;;  %v96_v29 = vld [vmem:[#allocation9 + $0x8] sm:$0xff] }
  0x3d   :  { %332 = vmatprep.subr.mxu0 %v517_v0  ;;  %367 = vmatprep.subr.mxu1 %v517_v0  ;;  %v79_v30 = vld [vmem:[#allocation8 + $0x8] sm:$0xff]  ;;  %v95_v31 = vld [vmem:[#allocation9] sm:$0xff]  ;;  %v94_v33 = vld [vmem:[#allocation6] sm:$0xff] }
  0x3e   :  { %333 = vmatpush3.msra.mxu0 %v106_v9  ;;  %368 = vmatpush3.msra.mxu1 %v89_v10  ;;  %v78_v32 = vld [vmem:[#allocation8] sm:$0xff]  ;;  %v77_v34 = vld [vmem:[#allocation3] sm:$0xff] }
  0x3f   :  { %334 = vmatprep.subr.mxu0 %v517_v0  ;;  %369 = vmatprep.subr.mxu1 %v517_v0  ;;  %v288_v35 = vld [vmem:[%s609_s4 + $0x1] ss:$0 sm:$0xff]  ;;  %v289_v39 = vld [vmem:[%s609_s4] ss:$0 sm:$0xff] }
  0x40   :  { %335 = vmatpush3.msra.mxu0 %v105_v11  ;;  %370 = vmatpush3.msra.mxu1 %v88_v12 }
  0x41   :  { %336 = vmatprep.subr.mxu0 %v517_v0  ;;  %371 = vmatprep.subr.mxu1 %v517_v0 }
  0x42   :  { %337 = vmatpush3.msra.mxu0 %v104_v13  ;;  %372 = vmatpush3.msra.mxu1 %v87_v14 }
  0x43   :  { %338 = vmatprep.subr.mxu0 %v517_v0  ;;  %373 = vmatprep.subr.mxu1 %v517_v0 }
  0x44   :  { %339 = vmatpush3.msra.mxu0 %v103_v15  ;;  %374 = vmatpush3.msra.mxu1 %v86_v16 }
  0x45   :  { %340 = vmatprep.subr.mxu0 %v517_v0  ;;  %375 = vmatprep.subr.mxu1 %v517_v0 }
  0x46   :  { %341 = vmatpush3.msra.mxu0 %v102_v17  ;;  %376 = vmatpush3.msra.mxu1 %v85_v18 }
  0x47   :  { %342 = vmatprep.subr.mxu0 %v517_v0  ;;  %377 = vmatprep.subr.mxu1 %v517_v0 }
  0x48   :  { %343 = vmatpush3.msra.mxu0 %v101_v19  ;;  %378 = vmatpush3.msra.mxu1 %v84_v20 }
  0x49   :  { %344 = vmatprep.subr.mxu0 %v517_v0  ;;  %379 = vmatprep.subr.mxu1 %v517_v0 }
  0x4a   :  { %345 = vmatpush3.msra.mxu0 %v100_v21  ;;  %380 = vmatpush3.msra.mxu1 %v83_v22 }
  0x4b   :  { %346 = vmatprep.subr.mxu0 %v517_v0  ;;  %381 = vmatprep.subr.mxu1 %v517_v0 }
  0x4c   :  { %347 = vmatpush3.msra.mxu0 %v99_v23  ;;  %382 = vmatpush3.msra.mxu1 %v82_v24 }
  0x4d   :  { %348 = vmatprep.subr.mxu0 %v517_v0  ;;  %383 = vmatprep.subr.mxu1 %v517_v0 }
  0x4e   :  { %349 = vmatpush3.msra.mxu0 %v98_v25  ;;  %384 = vmatpush3.msra.mxu1 %v81_v26 }
  0x4f   :  { %350 = vmatprep.subr.mxu0 %v517_v0  ;;  %385 = vmatprep.subr.mxu1 %v517_v0 }
  0x50   :  { %351 = vmatpush3.msra.mxu0 %v97_v27  ;;  %386 = vmatpush3.msra.mxu1 %v80_v28 }
  0x51   :  { %352 = vmatprep.subr.mxu0 %v517_v0  ;;  %387 = vmatprep.subr.mxu1 %v517_v0 }
  0x52   :  { %353 = vmatpush3.msra.mxu0 %v96_v29  ;;  %388 = vmatpush3.msra.mxu1 %v79_v30 }
  0x53   :  { %354 = vmatprep.subr.mxu0 %v517_v0  ;;  %389 = vmatprep.subr.mxu1 %v517_v0 }
  0x54   :  { %355 = vmatpush3.msra.mxu0 %v95_v31  ;;  %390 = vmatpush3.msra.mxu1 %v78_v32 }
  0x55   :  { %357 = vmatmul.mubr.f32.vlgmr.msra.gmra.mxu0 %v94_v33  ;;  %392 = vmatmul.mubr.f32.vlgmr.msra.gmra.mxu1 %v77_v34 }
 0x115   :  { %v177_v36 = vpop.f32.mrf.mxu0  ;;  %v254_v37 = vpop.f32.mrf.mxu1 }
 0x116   :  { %v187_v38 = vmul.f32 %v288_v35, %v177_v36 }
 0x117   :  { %v358_v40 = vpop.f32.mrf.mxu0  ;;  %v393_v41 = vpop.f32.mrf.mxu1 }
 0x118   :  { %v255_v42 = vadd.f32 %v254_v37, %v187_v38 }
 0x11a   :  { %v269_v43 = vadd.f32 %v289_v39, %v255_v42 }
 0x11c   :  { %270 = vst [vmem:[#allocation11] sm:$0xff] %v269_v43 }
 0x11d   :  { %494 = shalt.err (!%p491_p10)
}
 0x11e   :  { %280 = dma.vmem_to_hbm [thread:$0]  %s278_s16, 128, %s610_s5, [#allocation5]  }
 0x11f   :  { %509 = dma.done.wait [#allocation5], 128  }
 0x120   :  { %510 = vsyncadd [#allocation5], 4294967168 }
 0x121   :  { %284 = vsyncpa [#allocation4], 1 }
 0x122   :  { %285 = vsyncpa [#allocation7], 1 }
 0x123   :  { %286 = vsyncpa [#allocation10], 1 }
 0x124   :  { %287 = vsyncpa [#allocation5], 1 }

</bundles_post_ra>
